<compile_context>
chip_gen: v7x
topology: tpu7x:2x2x1
jax: 0.10.0
libtpu: 0.0.40
codegen_flags: <defaults>
</compile_context>

<pallas_src>
import functools

import jax
import jax.numpy as jnp
from jax import lax
from jax.experimental import pallas as pl
from jax.experimental.pallas import tpu as pltpu


def mlp_kernel(x_ref, w_ref, b_ref, out_ref, *, n_feat, n_hid, n_relu):
    """Fused MLP forward on one (TB, F) batch tile.

    x_ref   : (TB, F)       input rows (batch on sublanes on entry)
    w_ref   : (L, H, Kmax)  packed weights, PyTorch (out, in) layout, zero-padded
    b_ref   : (L, H, 1)     packed biases as column vectors, zero-padded
    out_ref : (1, TB)       lane-dense sigmoid output
    """
    x = x_ref[...]                                           # (TB, F) f32

    # fc1: contract feature axis of (H, F) with feature axis of (TB, F) -> (H, TB).
    # dot_general with contracting dims ((1,), (1,)) -> MXU, no transposed copy.
    h = lax.dot_general(
        w_ref[0, :, :n_feat], x,
        dimension_numbers=(((1,), (1,)), ((), ())),
        preferred_element_type=jnp.float32,
    ) + b_ref[0]
    h = jnp.maximum(h, 0.0)                                  # relu (dropout = identity)

    # hidden relu layers: plain (H, H) @ (H, TB); batch stays on lanes.
    for l in range(1, n_relu):
        h = jnp.dot(w_ref[l, :, :n_hid], h,
                    preferred_element_type=jnp.float32) + b_ref[l]
        h = jnp.maximum(h, 0.0)

    # fc4 + sigmoid: (1, H) @ (H, TB) -> (1, TB), written lane-dense.
    logits = jnp.dot(w_ref[n_relu, :1, :n_hid], h,
                     preferred_element_type=jnp.float32) + b_ref[n_relu, :1]
    out_ref[...] = jax.nn.sigmoid(logits)


def _pick_batch_tile(batch):
    # Lane-dense output tile (1, TB) needs TB % 128 == 0 unless TB == batch
    # (full-array block). Prefer the largest divisible tile.
    for cand in (512, 256, 128):
        if batch % cand == 0:
            return cand
    return batch


def mlp_forward(x, w_pack, b_pack):
    """x: (B, ...) flattened from dim 1 (like the torch module). Returns (B,)."""
    x = x.reshape(x.shape[0], -1).astype(jnp.float32)        # torch: x.flatten(start_dim=1)
    batch, n_feat = x.shape
    n_layers, n_hid, k_max = w_pack.shape
    n_relu = n_layers - 1

    tb = _pick_batch_tile(batch)
    grid = (batch // tb,)

    kernel = functools.partial(mlp_kernel, n_feat=n_feat, n_hid=n_hid, n_relu=n_relu)
    out = pl.pallas_call(
        kernel,
        out_shape=jax.ShapeDtypeStruct((1, batch), jnp.float32),
        grid_spec=pltpu.PrefetchScalarGridSpec(
            num_scalar_prefetch=0,
            grid=grid,
            in_specs=[
                # batch tile of the input rows; auto double-buffered across steps
                pl.BlockSpec((tb, n_feat), lambda i: (i, 0)),
                # packed weights / biases: same block every step -> stay resident
                pl.BlockSpec((n_layers, n_hid, k_max), lambda i: (0, 0, 0)),
                pl.BlockSpec((n_layers, n_hid, 1), lambda i: (0, 0, 0)),
            ],
            out_specs=pl.BlockSpec((1, tb), lambda i: (0, i)),
        ),
        # Batch axis is embarrassingly parallel -> v7x shards it over 2 TCs.
        compiler_params=pltpu.CompilerParams(dimension_semantics=("parallel",)),
    )(x, w_pack, b_pack)

    # torch: .squeeze() on (B, 1) -> (B,); here the kernel output is (1, B).
    return out[0]


def init_params(key, nbr_features, hidden_size=10, num_layers=3):
    """Deterministic init mimicking nn.Linear default (uniform +/- 1/sqrt(fan_in))."""

    def linear(k, out_f, in_f):
        kw, kb = jax.random.split(k)
        bound = 1.0 / jnp.sqrt(jnp.float32(in_f))
        w = jax.random.uniform(kw, (out_f, in_f), jnp.float32, -bound, bound)
        b = jax.random.uniform(kb, (out_f,), jnp.float32, -bound, bound)
        return w, b

    keys = jax.random.split(key, num_layers + 1)
    params = {}
    params["w1"], params["b1"] = linear(keys[0], hidden_size, nbr_features)
    for l in range(1, num_layers):                            # num_layers - 1 hidden layers
        params[f"w{l + 1}"], params[f"b{l + 1}"] = linear(keys[l], hidden_size, hidden_size)
    params[f"w{num_layers + 1}"], params[f"b{num_layers + 1}"] = linear(
        keys[num_layers], 1, hidden_size)
    return params


def pack_params(params, num_layers=3):
    """Pack the num_layers+1 Linear layers into two zero-padded buffers."""
    n_hid, n_feat = params["w1"].shape
    n_layers = num_layers + 1
    k_max = max(n_feat, n_hid)
    w_pack = jnp.zeros((n_layers, n_hid, k_max), jnp.float32)
    b_pack = jnp.zeros((n_layers, n_hid, 1), jnp.float32)
    w_pack = w_pack.at[0, :, :n_feat].set(params["w1"])
    b_pack = b_pack.at[0, :, 0].set(params["b1"])
    for l in range(1, num_layers):
        w_pack = w_pack.at[l, :, :n_hid].set(params[f"w{l + 1}"])
        b_pack = b_pack.at[l, :, 0].set(params[f"b{l + 1}"])
    w_pack = w_pack.at[n_layers - 1, :1, :n_hid].set(params[f"w{n_layers}"])
    b_pack = b_pack.at[n_layers - 1, :1, 0].set(params[f"b{n_layers}"])
    return w_pack, b_pack


def mlp_reference(x, params, num_layers=3):
    """Pure-JAX reference of the PyTorch forward (eval mode)."""
    h = x.reshape(x.shape[0], -1)
    for l in range(1, num_layers + 1):
        h = jnp.maximum(h @ params[f"w{l}"].T + params[f"b{l}"], 0.0)
    out = jax.nn.sigmoid(h @ params[f"w{num_layers + 1}"].T + params[f"b{num_layers + 1}"])
    return jnp.squeeze(out, axis=-1)


if __name__ == "__main__":
    key = jax.random.PRNGKey(0)
    kx_small, kx_big, kp = jax.random.split(key, 3)

    nbr_features = 32
    hidden_size = 10
    num_layers = 3

    params = init_params(kp, nbr_features, hidden_size=hidden_size, num_layers=num_layers)
    w_pack, b_pack = pack_params(params, num_layers=num_layers)

    # Small batch (single-block path). forward flattens from dim 1: 4*8 = 32 features.
    x_small = jax.random.normal(kx_small, (8, 4, 8), jnp.float32)
    out_small = mlp_forward(x_small, w_pack, b_pack)
    jax.block_until_ready(out_small)
    ref_small = mlp_reference(x_small, params, num_layers)
    assert out_small.shape == (8,), out_small.shape
    assert jnp.allclose(out_small, ref_small, atol=1e-5, rtol=1e-5), "small-batch mismatch"

    # Larger batch exercising the 1-D batch grid (tile = 512 -> 2 grid steps).
    x_big = jax.random.normal(kx_big, (1024, nbr_features), jnp.float32)
    out_big = mlp_forward(x_big, w_pack, b_pack)
    jax.block_until_ready(out_big)
    ref_big = mlp_reference(x_big, params, num_layers)
    assert out_big.shape == (1024,), out_big.shape
    assert jnp.allclose(out_big, ref_big, atol=1e-5, rtol=1e-5), "big-batch mismatch"

    print("KERNEL_OK")
</pallas_src>

<mosaic_0001>
module attributes {stable_mosaic.version = 11 : i64} {
  func.func @mlp_kernel(%arg0: i32, %arg1: memref<8x32xf32, #tpu.memory_space<vmem>>, %arg2: memref<4x10x32xf32, #tpu.memory_space<vmem>>, %arg3: memref<4x10x1xf32, #tpu.memory_space<vmem>>, %arg4: memref<1x8xf32, #tpu.memory_space<vmem>>) attributes {dimension_semantics = [#tpu.dimension_semantics<parallel>], iteration_bounds = array<i64: 1>, scalar_prefetch = 0 : i64, scratch_operands = 0 : i64, tpu.core_type = #tpu.core_type<tc>, window_params = [{transform_indices = @transform_0, window_bounds = array<i64: 8, 32>}, {pipeline_mode = #tpu.pipeline_mode<synchronous>, transform_indices = @transform_1, window_bounds = array<i64: 4, 10, 32>}, {pipeline_mode = #tpu.pipeline_mode<synchronous>, transform_indices = @transform_2, window_bounds = array<i64: 4, 10, 1>}, {transform_indices = @transform_3, window_bounds = array<i64: 1, 8>}]} {
    %c0 = arith.constant 0 : index
    %c0_0 = arith.constant 0 : index
    %0 = vector.load %arg1[%c0, %c0_0] : memref<8x32xf32, #tpu.memory_space<vmem>>, vector<8x32xf32>
    %c0_1 = arith.constant 0 : index
    %c0_2 = arith.constant 0 : index
    %c0_3 = arith.constant 0 : index
    %1 = vector.load %arg2[%c0_1, %c0_2, %c0_3] : memref<4x10x32xf32, #tpu.memory_space<vmem>>, vector<1x10x32xf32>
    %2 = vector.shape_cast %1 : vector<1x10x32xf32> to vector<10x32xf32>
    %cst = arith.constant dense<0.000000e+00> : vector<10x8xf32>
    %3 = tpu.matmul %2, %0, %cst {dimension_numbers = #tpu.dot_dimension_numbers<[1], [1], [0], [0], [0, 0, 1, 0], [], []>} : vector<10x32xf32>, vector<8x32xf32>, vector<10x8xf32> -> vector<10x8xf32>
    %c0_4 = arith.constant 0 : index
    %c0_5 = arith.constant 0 : index
    %c0_6 = arith.constant 0 : index
    %4 = vector.load %arg3[%c0_4, %c0_5, %c0_6] : memref<4x10x1xf32, #tpu.memory_space<vmem>>, vector<1x10x1xf32>
    %5 = vector.shape_cast %4 : vector<1x10x1xf32> to vector<10x1xf32>
    %6 = vector.broadcast %5 : vector<10x1xf32> to vector<10x8xf32>
    %7 = arith.addf %3, %6 : vector<10x8xf32>
    %cst_7 = arith.constant 0.000000e+00 : f32
    %8 = vector.broadcast %cst_7 : f32 to vector<10x8xf32>
    %9 = arith.maximumf %7, %8 : vector<10x8xf32>
    %c1 = arith.constant 1 : index
    %c0_8 = arith.constant 0 : index
    %c0_9 = arith.constant 0 : index
    %10 = vector.load %arg2[%c1, %c0_8, %c0_9] : memref<4x10x32xf32, #tpu.memory_space<vmem>>, vector<1x10x10xf32>
    %11 = vector.shape_cast %10 : vector<1x10x10xf32> to vector<10x10xf32>
    %cst_10 = arith.constant dense<0.000000e+00> : vector<10x8xf32>
    %12 = tpu.matmul %11, %9, %cst_10 {dimension_numbers = #tpu.dot_dimension_numbers<[1], [0], [0], [1], [0, 0, 1, 1], [], []>} : vector<10x10xf32>, vector<10x8xf32>, vector<10x8xf32> -> vector<10x8xf32>
    %c1_11 = arith.constant 1 : index
    %c0_12 = arith.constant 0 : index
    %c0_13 = arith.constant 0 : index
    %13 = vector.load %arg3[%c1_11, %c0_12, %c0_13] : memref<4x10x1xf32, #tpu.memory_space<vmem>>, vector<1x10x1xf32>
    %14 = vector.shape_cast %13 : vector<1x10x1xf32> to vector<10x1xf32>
    %15 = vector.broadcast %14 : vector<10x1xf32> to vector<10x8xf32>
    %16 = arith.addf %12, %15 : vector<10x8xf32>
    %cst_14 = arith.constant 0.000000e+00 : f32
    %17 = vector.broadcast %cst_14 : f32 to vector<10x8xf32>
    %18 = arith.maximumf %16, %17 : vector<10x8xf32>
    %c2 = arith.constant 2 : index
    %c0_15 = arith.constant 0 : index
    %c0_16 = arith.constant 0 : index
    %19 = vector.load %arg2[%c2, %c0_15, %c0_16] : memref<4x10x32xf32, #tpu.memory_space<vmem>>, vector<1x10x10xf32>
    %20 = vector.shape_cast %19 : vector<1x10x10xf32> to vector<10x10xf32>
    %cst_17 = arith.constant dense<0.000000e+00> : vector<10x8xf32>
    %21 = tpu.matmul %20, %18, %cst_17 {dimension_numbers = #tpu.dot_dimension_numbers<[1], [0], [0], [1], [0, 0, 1, 1], [], []>} : vector<10x10xf32>, vector<10x8xf32>, vector<10x8xf32> -> vector<10x8xf32>
    %c2_18 = arith.constant 2 : index
    %c0_19 = arith.constant 0 : index
    %c0_20 = arith.constant 0 : index
    %22 = vector.load %arg3[%c2_18, %c0_19, %c0_20] : memref<4x10x1xf32, #tpu.memory_space<vmem>>, vector<1x10x1xf32>
    %23 = vector.shape_cast %22 : vector<1x10x1xf32> to vector<10x1xf32>
    %24 = vector.broadcast %23 : vector<10x1xf32> to vector<10x8xf32>
    %25 = arith.addf %21, %24 : vector<10x8xf32>
    %cst_21 = arith.constant 0.000000e+00 : f32
    %26 = vector.broadcast %cst_21 : f32 to vector<10x8xf32>
    %27 = arith.maximumf %25, %26 : vector<10x8xf32>
    %c3 = arith.constant 3 : index
    %c0_22 = arith.constant 0 : index
    %c0_23 = arith.constant 0 : index
    %28 = vector.load %arg2[%c3, %c0_22, %c0_23] : memref<4x10x32xf32, #tpu.memory_space<vmem>>, vector<1x1x10xf32>
    %29 = vector.shape_cast %28 : vector<1x1x10xf32> to vector<1x10xf32>
    %cst_24 = arith.constant dense<0.000000e+00> : vector<1x8xf32>
    %30 = tpu.matmul %29, %27, %cst_24 {dimension_numbers = #tpu.dot_dimension_numbers<[1], [0], [0], [1], [0, 0, 1, 1], [], []>} : vector<1x10xf32>, vector<10x8xf32>, vector<1x8xf32> -> vector<1x8xf32>
    %c3_25 = arith.constant 3 : index
    %c0_26 = arith.constant 0 : index
    %c0_27 = arith.constant 0 : index
    %31 = vector.load %arg3[%c3_25, %c0_26, %c0_27] : memref<4x10x1xf32, #tpu.memory_space<vmem>>, vector<1x1x1xf32>
    %32 = vector.shape_cast %31 : vector<1x1x1xf32> to vector<1x1xf32>
    %33 = vector.broadcast %32 : vector<1x1xf32> to vector<1x8xf32>
    %34 = arith.addf %30, %33 : vector<1x8xf32>
    %35 = arith.negf %34 : vector<1x8xf32>
    %36 = math.exp %35 : vector<1x8xf32>
    %cst_28 = arith.constant 1.000000e+00 : f32
    %37 = vector.broadcast %cst_28 : f32 to vector<1x8xf32>
    %38 = arith.addf %37, %36 : vector<1x8xf32>
    %39 = arith.divf %37, %38 : vector<1x8xf32>
    %c0_29 = arith.constant 0 : index
    %c0_30 = arith.constant 0 : index
    %40 = vector.load %arg4[%c0_29, %c0_30] : memref<1x8xf32, #tpu.memory_space<vmem>>, vector<1x8xf32>
    tpu.vector_store %arg4[%c0_29, %c0_30], %39 {strides = array<i32>} : memref<1x8xf32, #tpu.memory_space<vmem>>, vector<1x8xf32>,
    return
  }
  func.func @transform_0(%arg0: i32) -> (i32, i32) {
    %c0_i32 = arith.constant 0 : i32
    %c0_i32_0 = arith.constant 0 : i32
    return %arg0, %c0_i32 : i32, i32
  }
  func.func @transform_1(%arg0: i32) -> (i32, i32, i32) {
    %c0_i32 = arith.constant 0 : i32
    %c0_i32_0 = arith.constant 0 : i32
    %c0_i32_1 = arith.constant 0 : i32
    %c0_i32_2 = arith.constant 0 : i32
    return %c0_i32, %c0_i32_0, %c0_i32_1 : i32, i32, i32
  }
  func.func @transform_2(%arg0: i32) -> (i32, i32, i32) {
    %c0_i32 = arith.constant 0 : i32
    %c0_i32_0 = arith.constant 0 : i32
    %c0_i32_1 = arith.constant 0 : i32
    %c0_i32_2 = arith.constant 0 : i32
    return %c0_i32, %c0_i32_0, %c0_i32_1 : i32, i32, i32
  }
  func.func @transform_3(%arg0: i32) -> (i32, i32) {
    %c0_i32 = arith.constant 0 : i32
    %c0_i32_0 = arith.constant 0 : i32
    return %c0_i32, %arg0 : i32, i32
  }
}

</mosaic_0001>

<bundles_post_ra>
// kernel: tpu_custom_call.1
= control target key start
LH: loop header
LB: loop body
LE: loop exit
PB: predicated region body
PF: predicated region fallthrough
CT: control target
= control target key end

     0   :  { %vm30_vm0 = vcmask 261120   ;;  %v544_v4 = vmov 0   ;;  %s646_s0 = inlined_call_operand.vmem [shape: f32[8,32], index: 0, kind: input, shape index: {}]   ;;  %s647_s1 = inlined_call_operand.vmem [shape: f32[4,10,32], index: 1, kind: input, shape index: {}]   ;;  %s648_s2 = inlined_call_operand.vmem [shape: f32[4,10,1], index: 2, kind: input, shape index: {}]   ;;  %s649_s3 = inlined_call_operand.hbm [shape: f32[1,8], index: 3, kind: output, shape index: {}]  }
   0x1   :  { %v15_v0 = vld [vmem:[%s646_s0] sm:$0xff]  ;;  %v17_v3 = vld [vmem:[%s647_s1 + $0x8] sm:$0x3]  ;;  %514 = vset.pattern.permute.xlu0 %v544_v4 }
   0x2   :  { %v16_v1 = vld [vmem:[%s647_s1] sm:$0xff]  ;;  %466 = vmatprep.subr.msk.mxu0 %vm30_vm0, %v15_v0 }
   0x3   :  { %468 = vmatprep.mubr.msk.f32.mxu0 %vm30_vm0, %v16_v1  ;;  %v18_v2 = vld [vmem:[%s648_s2] sm:$0xff]  ;;  %467 = vmatpush3.xpose.msk.msra.mxu0 %vm30_vm0, %v15_v0 }
   0x4   :  { %8 = vsyncpa [#allocation3], 0  ;;  %22 = vperm.xlu0 %514, %v18_v2   ;;  %515 = vset.pattern.permute.xlu1 %v544_v4  ;;  %v19_v5 = vld [vmem:[%s648_s2 + $0x8] sm:$0x3]  ;;  %v442_v6 = vld [vmem:[%s648_s2 + $0x20] sm:$0xff]  ;;  %vm133_vm1 = vcmask 80896  }
   0x5   :  { %v448_v7 = vld [vmem:[%s648_s2 + $0x30] sm:$0x1]  ;;  %v436_v10 = vld [vmem:[%s648_s2 + $0x18] sm:$0x3]  ;;  %v443_v11 = vld [vmem:[%s648_s2 + $0x28] sm:$0x3] }
   0x6   :  { %469 = vmatmul.mubr.msk.f32.vlgmr.msra.gmra.mrb[0].mxu0 %vm30_vm0, %v17_v3  ;;  %v433_v8 = vld [vmem:[%s647_s1 + $0x10] sm:$0xff]  ;;  %vm140_vm2 = vcmask 1041408   ;;  %vm545_vm3 = vmmov 1   ;;  %v434_v22 = vld [vmem:[%s647_s1 + $0x18] sm:$0x3]  ;;  %v440_v23 = vld [vmem:[%s647_s1 + $0x20] sm:$0xff] }
   0x7   :  { %475 = vmatprep.mubr.msk.f32.mxu1 %vm133_vm1, %v433_v8  ;;  %v435_v9 = vld [vmem:[%s648_s2 + $0x10] sm:$0xff]  ;;  %vm604_vm4 = vmpackc.low %vm140_vm2, %vm545_vm3  ;;  %482 = vmatprep.mubr.msk.f32.mxu0 %vm133_vm1, %v440_v23  ;;  %v441_v33 = vld [vmem:[%s647_s1 + $0x28] sm:$0x3]  ;;  %v546_v34 = vmov 0.0|0.0   ;;  %vm547_vm5 = vmmov 0   ;;  %v548_v35 = vmov 0.0  }
   0x8   :  { %27 = vperm.xlu0 %514, %v19_v5   ;;  %125 = vperm.xlu1 %515, %v435_v9   ;;  %v447_v45 = vld [vmem:[%s647_s1 + $0x30] sm:$0x1]  ;;  %s549_s13 = smov [#allocation2]   ;;  %vm414_vm6 = vcmask 57344  }
   0x9   :  { %s422_s14 = sshll.u32 %s549_s13, 4  ;;  %s423_s14 = int_to_ptr.vmem [resolvable:$true] %s422_s14 }
   0xa   :  { %s520_s15 = scalar_lea.vmem %s423_s14, 16  ;;  %s524_s1 = scalar_lea.vmem %s423_s14, 32 }
   0xb   :  { %p521_p0 = scmp.ne.s32.totalorder %s423_s14, %s520_s15  ;;  %p525_p1 = scmp.lt.s32.totalorder %s423_s14, %s423_s14 }
   0xc   :  { %229 = vperm.xlu0 %514, %v442_v6   ;;  %130 = vperm.xlu1 %515, %v436_v10   ;;  %p526_p2 = scmp.lt.s32.totalorder %s524_s1, %s520_s15 }
   0xe   :  { %p527_p3 = por %p526_p2, %p525_p1 }
  0x10   :  { %329 = vperm.xlu0 %514, %v448_v7   ;;  %234 = vperm.xlu1 %515, %v443_v11   ;;  %p528_p4 = pnand %p527_p3, %p521_p0 }
  0x83   :  { %v23_v12 = vpop.permute.xlu0 %22 }
  0x87   :  { %v28_v13 = vpop.permute.xlu0 %27  ;;  %v126_v24 = vpop.permute.xlu1 %125 }
  0x8b   :  { %v131_v25 = vpop.permute.xlu1 %130  ;;  %v230_v38 = vpop.permute.xlu0 %229 }
  0x8f   :  { %v235_v36 = vpop.permute.xlu1 %234  ;;  %v330_v46 = vpop.permute.xlu0 %329 }
  0xd9   :  { %v470_v14 = vpop.f32.mrb[0].mxu0 }
  0xda   :  { %v112_v15 = vadd.f32 %v470_v14, %v28_v13  ;;  %v106_v16 = vpop.f32.mrb[1].mxu0 }
  0xdb   :  { %v107_v17 = vadd.f32 %v106_v16, %v23_v12 }
  0xdc   :  { %v116_v18 = vmax.f32 %v112_v15, 0.0 }
  0xdd   :  { %v115_v19 = vmax.f32 %v107_v17, 0.0 }
  0xdf   :  { %v492_v21 = vpack.c.bf16 %v116_v18, %v115_v19 }
  0xe1   :  { %494 = vmatprep.subr.msk.bf16.mxu1 %vm604_vm4, %v492_v21 }
  0xe2   :  { %497 = vmatpush3.bf16.msk.msra.mxu1 %vm604_vm4, %v492_v21 }
  0xe3   :  { %504 = vmatprep.subr.bf16.mxu1 %v546_v34 }
  0xe5   :  { %476 = vmatmul.mubr.msk.f32.vlgmr.msra.gmra.mrb[0].mxu1 %vm133_vm1, %v434_v22 }
  0xe6   :  { %489 = vmatprep.mubr.msk.f32.mxu1 %vm547_vm5, %v548_v35 }
 0x1b8   :  { %v477_v26 = vpop.f32.mrb[0].mxu1 }
 0x1b9   :  { %v216_v27 = vadd.f32 %v477_v26, %v131_v25  ;;  %v210_v28 = vpop.f32.mrb[1].mxu1 }
 0x1ba   :  { %v211_v29 = vadd.f32 %v210_v28, %v126_v24 }
 0x1bb   :  { %v220_v30 = vmax.f32 %v216_v27, 0.0 }
 0x1bc   :  { %v219_v31 = vmax.f32 %v211_v29, 0.0 }
 0x1be   :  { %v498_v32 = vpack.c.bf16 %v220_v30, %v219_v31 }
 0x1c0   :  { %500 = vmatprep.subr.msk.bf16.mxu0 %vm604_vm4, %v498_v32 }
 0x1c1   :  { %503 = vmatpush3.bf16.msk.msra.mxu0 %vm604_vm4, %v498_v32 }
 0x1c4   :  { %483 = vmatmul.mubr.msk.f32.vlgmr.msra.gmra.mrb[2].mxu0 %vm133_vm1, %v441_v33 }
 0x297   :  { %v484_v37 = vpop.f32.mrb[2].mxu0 }
 0x298   :  { %v318_v39 = vadd.f32 %v484_v37, %v235_v36  ;;  %v312_v40 = vpop.f32.mrb[3].mxu0 }
 0x299   :  { %v313_v41 = vadd.f32 %v312_v40, %v230_v38 }
 0x29a   :  { %v322_v42 = vmax.f32 %v318_v39, 0.0 }
 0x29b   :  { %v321_v43 = vmax.f32 %v313_v41, 0.0 }
 0x29d   :  { %v505_v44 = vpack.c.bf16 %v322_v42, %v321_v43 }
 0x29f   :  { %507 = vmatpush3.bf16.msk.msra.mxu1 %vm604_vm4, %v505_v44 }
 0x2a2   :  { %490 = vmatmul.mubr.msk.f32.vlgmr.msra.gmra.mrb[2].mxu1 %vm133_vm1, %v447_v45 }
 0x375   :  { %v404_v47 = vpop.f32.mrb[2].mxu1 }
 0x376   :  { %v405_v48 = vadd.f32 %v404_v47, %v330_v46  ;;  %v491_v49 = vpop.f32.mrb[3].mxu1 }
 0x378   :  { %v451_v50 = vmul.f32 -1.442695, %v405_v48 }
 0x37a   :  { %516 = vpow2.f32 %v451_v50 }
 0x384   :  { %v517_v51 = vpop.eup %516 }
 0x385   :  { %v411_v52 = vadd.f32 1.0, %v517_v51 }
 0x387   :  { %518 = vrcp.f32 %v411_v52 }
 0x391   :  { %v519_v53 = vpop.eup %518 }
 0x392   :  { %415 = vst.msk [vmem:[#allocation2] sm:$0x1] %vm414_vm6, %v519_v53 }
 0x393   :  { %531 = shalt.err (!%p528_p4)
}
 0x394   :  { %s532_s18 = scalar_lea.hbm %s649_s3, 16 }
 0x395   :  { %p533_p5 = scmp.ne.s32.totalorder %s649_s3, %s532_s18  ;;  %p536_p6 = scmp.lt.u32.totalorder %s532_s18, %s649_s3 }
 0x397   :  { %p538_p7 = pnand %p536_p6, %p533_p5 }
 0x399   :  { %541 = shalt.err (!%p538_p7)
}
 0x39a   :  { %425 = dma.vmem_to_hbm [thread:$0]  %s423_s14, 16, %s649_s3, [#allocation3]  }
 0x39b   :  { %542 = dma.done.wait [#allocation3], 16  }
 0x39c   :  { %543 = vsyncadd [#allocation3], 4294967280 }
 0x39d   :  { %429 = vsyncpa [#allocation3], 1 }

</bundles_post_ra>
